<compile_context>
chip_gen: v7x
topology: tpu7x:2x2x1
jax: 0.10.0
libtpu: 0.0.40
codegen_flags: <defaults>
</compile_context>

<pallas_src>
import jax
import jax.numpy as jnp
from jax.experimental import pallas as pl
from jax.experimental.pallas import tpu as pltpu

# ---- problem sizes (small, consistent with the module) ----------------------
N = 2            # batch
C_IN = 3         # backbone input channels (module assumes 3)
H = W = 16       # spatial
HW = H * W
C_BB = 32        # backbone output channels == self.out_shape
EMB = 32         # embedding_num
NCLS = 8         # num_classes
BN_EPS = 1e-5
L2_EPS = 1e-12   # F.normalize default eps

# ---- packed-parameter slab layout: (P_ROWS, 128) f32, 8-aligned row starts --
ROW_WCONV = 0      # [0:32,   0:3 ]  conv weight, stored transposed (C_BB, C_IN)
ROW_WFC   = 32     # [32:64,  0:32]  fc weight (C_BB, EMB), pre-scaled by 1/HW
ROW_WCLS  = 64     # [64:96,  0:8 ]  cls weight (EMB, NCLS)
ROW_GAMMA = 96     # [96,     0:32]  BatchNorm1d gamma
ROW_BETA  = 104    # [104,    0:32]  BatchNorm1d beta
ROW_BCLS  = 112    # [112,    0:8 ]  cls bias
P_ROWS = 120
P_LANES = 128
OUT_LANES = 128    # packed output: lanes [0:EMB) = emb, [EMB:EMB+NCLS) = cls


def ssnet_kernel(x_ref, p_ref, out_ref):
    # x_ref:   (N, C_IN, HW) f32  -- free reshape of NCHW, lane dim = HW
    # p_ref:   (P_ROWS, 128) f32  -- packed parameters
    # out_ref: (N, 128)      f32  -- lanes [0:EMB)=emb, [EMB:EMB+NCLS)=cls
    x = x_ref[...]

    wc    = p_ref[ROW_WCONV:ROW_WCONV + C_BB, 0:C_IN]   # (C_BB, C_IN)
    wfc_s = p_ref[ROW_WFC:ROW_WFC + C_BB, 0:EMB]        # (C_BB, EMB), 1/HW folded in
    wcls  = p_ref[ROW_WCLS:ROW_WCLS + EMB, 0:NCLS]      # (EMB, NCLS)
    gamma = p_ref[ROW_GAMMA:ROW_GAMMA + 1, 0:EMB]       # (1, EMB)
    beta  = p_ref[ROW_BETA:ROW_BETA + 1, 0:EMB]         # (1, EMB)
    bcls  = p_ref[ROW_BCLS:ROW_BCLS + 1, 0:NCLS]        # (1, NCLS)

    # ---- backbone: 1x1 conv (K=3 -> 3 broadcasted VPU FMAs, whole batch) + ReLU
    h = x[:, 0:1, :] * wc[None, :, 0:1]                 # (N, C_BB, HW)
    for c in range(1, C_IN):                            # C_IN=3, static unroll
        h = h + x[:, c:c + 1, :] * wc[None, :, c:c + 1]
    h = jnp.maximum(h, 0.0)

    # ---- adaptive avg pool over HW (1/HW already folded into wfc_s)
    pooled = jnp.sum(h, axis=-1)                        # (N, C_BB)

    # TODO(synk): Dropout(0.3) applied as identity (inference mode); PyTorch's
    # training-time RNG dropout is not reproducible bit-for-bit.

    # ---- fc: Linear(no bias) + BatchNorm1d (training-mode batch statistics)
    z = jnp.dot(pooled, wfc_s, preferred_element_type=jnp.float32)    # (N, EMB)
    mu = jnp.mean(z, axis=0, keepdims=True)
    var = jnp.mean((z - mu) ** 2, axis=0, keepdims=True)              # biased var
    before_norm = (z - mu) * jax.lax.rsqrt(var + BN_EPS) * gamma + beta

    # ---- emb = F.normalize(before_norm, p=2, dim=1): single EUP rsqrt
    #      x * rsqrt(max(||x||^2, eps^2)) == x / max(||x||, eps)
    sumsq = jnp.sum(before_norm * before_norm, axis=1, keepdims=True)  # (N, 1)
    emb = before_norm * jax.lax.rsqrt(jnp.maximum(sumsq, L2_EPS * L2_EPS))

    # ---- cls head
    cls = jnp.dot(before_norm, wcls, preferred_element_type=jnp.float32) + bcls

    # ---- single unmasked lane-dense (N, 128) store
    pad = jnp.zeros((N, OUT_LANES - EMB - NCLS), jnp.float32)
    out_ref[...] = jnp.concatenate([emb, cls, pad], axis=1)


def pack_params(wconv, wfc, gamma, beta, wcls, bcls):
    """Pack all small parameters into one lane-padded (P_ROWS, 128) slab."""
    p = jnp.zeros((P_ROWS, P_LANES), jnp.float32)
    p = p.at[ROW_WCONV:ROW_WCONV + C_BB, 0:C_IN].set(wconv.T)          # (C_BB, C_IN)
    p = p.at[ROW_WFC:ROW_WFC + C_BB, 0:EMB].set(wfc * (1.0 / HW))      # fold pooling mean
    p = p.at[ROW_WCLS:ROW_WCLS + EMB, 0:NCLS].set(wcls)
    p = p.at[ROW_GAMMA, 0:EMB].set(gamma.reshape(-1))
    p = p.at[ROW_BETA, 0:EMB].set(beta.reshape(-1))
    p = p.at[ROW_BCLS, 0:NCLS].set(bcls.reshape(-1))
    return p


def ssnet_forward(x_nchw, packed_params):
    # (N, C, H, W) -> (N, C, H*W): FREE reshape of NCHW, no transpose op.
    x = x_nchw.reshape(N, C_IN, HW)
    vmem = pl.BlockSpec(memory_space=pltpu.MemorySpace.VMEM)
    out = pl.pallas_call(
        ssnet_kernel,
        out_shape=jax.ShapeDtypeStruct((N, OUT_LANES), jnp.float32),
        in_specs=[vmem, vmem],
        out_specs=vmem,
    )(x, packed_params)
    return out[:, :EMB], out[:, EMB:EMB + NCLS]


def reference_forward(x_nchw, wconv, wfc, gamma, beta, wcls, bcls):
    """Pure-JAX reference with the module's semantics (independent derivation)."""
    x = jnp.transpose(x_nchw, (0, 2, 3, 1)).reshape(N, HW, C_IN).astype(jnp.float32)
    h = jnp.maximum(jnp.einsum('nsc,cd->nsd', x, wconv), 0.0)
    pooled = jnp.mean(h, axis=1)                       # AdaptiveAvgPool2d(1) + flatten
    z = pooled @ wfc                                   # Dropout as identity
    mu = jnp.mean(z, axis=0, keepdims=True)
    var = jnp.mean((z - mu) ** 2, axis=0, keepdims=True)
    before_norm = (z - mu) / jnp.sqrt(var + BN_EPS) * gamma + beta
    nrm = jnp.sqrt(jnp.sum(before_norm ** 2, axis=1, keepdims=True))
    emb = before_norm / jnp.maximum(nrm, L2_EPS)
    cls = before_norm @ wcls + bcls
    return emb, cls


if __name__ == "__main__":
    key = jax.random.PRNGKey(0)
    k_x, k_conv, k_fc, k_cls, k_b = jax.random.split(key, 5)

    # input (NCHW, like PyTorch)
    x = jax.random.normal(k_x, (N, C_IN, H, W), dtype=jnp.float32)

    # deterministic parameter init (shapes follow the module's __init__)
    wconv = 0.1 * jax.random.normal(k_conv, (C_IN, C_BB), dtype=jnp.float32)   # backbone 1x1 conv
    wfc = 0.01 * jax.random.normal(k_fc, (C_BB, EMB), dtype=jnp.float32)       # nn.init.normal_(0, 0.01)
    wcls = 0.01 * jax.random.normal(k_cls, (EMB, NCLS), dtype=jnp.float32)     # nn.init.normal_(0, 0.01)
    bound = 1.0 / (EMB ** 0.5)
    bcls = jax.random.uniform(k_b, (1, NCLS), minval=-bound, maxval=bound,
                              dtype=jnp.float32)                               # default Linear bias init
    gamma = jnp.ones((1, EMB), dtype=jnp.float32)                              # BatchNorm1d weight
    beta = jnp.zeros((1, EMB), dtype=jnp.float32)                              # BatchNorm1d bias

    params = pack_params(wconv, wfc, gamma, beta, wcls, bcls)

    emb, cls = ssnet_forward(x, params)
    jax.block_until_ready((emb, cls))

    emb_ref, cls_ref = reference_forward(x, wconv, wfc, gamma, beta, wcls, bcls)
    assert emb.shape == (N, EMB) and cls.shape == (N, NCLS)
    assert jnp.allclose(emb, emb_ref, atol=1e-4, rtol=1e-4)
    assert jnp.allclose(cls, cls_ref, atol=1e-4, rtol=1e-4)

    print("KERNEL_OK")
</pallas_src>

<mosaic_0001>
module attributes {stable_mosaic.version = 11 : i64} {
  func.func @ssnet_kernel(%arg0: memref<2x3x256xf32, #tpu.memory_space<vmem>>, %arg1: memref<120x128xf32, #tpu.memory_space<vmem>>, %arg2: memref<2x128xf32, #tpu.memory_space<vmem>>) attributes {dimension_semantics = [], scalar_prefetch = 0 : i64, scratch_operands = 0 : i64, tpu.core_type = #tpu.core_type<tc>} {
    %c0 = arith.constant 0 : index
    %c0_0 = arith.constant 0 : index
    %c0_1 = arith.constant 0 : index
    %0 = vector.load %arg0[%c0, %c0_0, %c0_1] : memref<2x3x256xf32, #tpu.memory_space<vmem>>, vector<2x3x256xf32>
    %c0_2 = arith.constant 0 : index
    %c0_3 = arith.constant 0 : index
    %1 = vector.load %arg1[%c0_2, %c0_3] : memref<120x128xf32, #tpu.memory_space<vmem>>, vector<32x3xf32>
    %c32 = arith.constant 32 : index
    %c0_4 = arith.constant 0 : index
    %2 = vector.load %arg1[%c32, %c0_4] : memref<120x128xf32, #tpu.memory_space<vmem>>, vector<32x32xf32>
    %c64 = arith.constant 64 : index
    %c0_5 = arith.constant 0 : index
    %3 = vector.load %arg1[%c64, %c0_5] : memref<120x128xf32, #tpu.memory_space<vmem>>, vector<32x8xf32>
    %c96 = arith.constant 96 : index
    %c0_6 = arith.constant 0 : index
    %4 = vector.load %arg1[%c96, %c0_6] : memref<120x128xf32, #tpu.memory_space<vmem>>, vector<1x32xf32>
    %c104 = arith.constant 104 : index
    %c0_7 = arith.constant 0 : index
    %5 = vector.load %arg1[%c104, %c0_7] : memref<120x128xf32, #tpu.memory_space<vmem>>, vector<1x32xf32>
    %c112 = arith.constant 112 : index
    %c0_8 = arith.constant 0 : index
    %6 = vector.load %arg1[%c112, %c0_8] : memref<120x128xf32, #tpu.memory_space<vmem>>, vector<1x8xf32>
    %7 = vector.extract_strided_slice %0 {offsets = [0, 0, 0], sizes = [2, 1, 256], strides = [1, 1, 1]} : vector<2x3x256xf32> to vector<2x1x256xf32>
    %8 = vector.extract_strided_slice %1 {offsets = [0, 0], sizes = [32, 1], strides = [1, 1]} : vector<32x3xf32> to vector<32x1xf32>
    %9 = vector.shape_cast %8 : vector<32x1xf32> to vector<1x32x1xf32>
    %10 = vector.broadcast %7 : vector<2x1x256xf32> to vector<2x32x256xf32>
    %11 = vector.broadcast %9 : vector<1x32x1xf32> to vector<2x32x256xf32>
    %12 = arith.mulf %10, %11 : vector<2x32x256xf32>
    %13 = vector.extract_strided_slice %0 {offsets = [0, 1, 0], sizes = [2, 1, 256], strides = [1, 1, 1]} : vector<2x3x256xf32> to vector<2x1x256xf32>
    %14 = vector.extract_strided_slice %1 {offsets = [0, 1], sizes = [32, 1], strides = [1, 1]} : vector<32x3xf32> to vector<32x1xf32>
    %15 = vector.shape_cast %14 : vector<32x1xf32> to vector<1x32x1xf32>
    %16 = vector.broadcast %13 : vector<2x1x256xf32> to vector<2x32x256xf32>
    %17 = vector.broadcast %15 : vector<1x32x1xf32> to vector<2x32x256xf32>
    %18 = arith.mulf %16, %17 : vector<2x32x256xf32>
    %19 = arith.addf %12, %18 : vector<2x32x256xf32>
    %20 = vector.extract_strided_slice %0 {offsets = [0, 2, 0], sizes = [2, 1, 256], strides = [1, 1, 1]} : vector<2x3x256xf32> to vector<2x1x256xf32>
    %21 = vector.extract_strided_slice %1 {offsets = [0, 2], sizes = [32, 1], strides = [1, 1]} : vector<32x3xf32> to vector<32x1xf32>
    %22 = vector.shape_cast %21 : vector<32x1xf32> to vector<1x32x1xf32>
    %23 = vector.broadcast %20 : vector<2x1x256xf32> to vector<2x32x256xf32>
    %24 = vector.broadcast %22 : vector<1x32x1xf32> to vector<2x32x256xf32>
    %25 = arith.mulf %23, %24 : vector<2x32x256xf32>
    %26 = arith.addf %19, %25 : vector<2x32x256xf32>
    %cst = arith.constant 0.000000e+00 : f32
    %27 = vector.broadcast %cst : f32 to vector<2x32x256xf32>
    %28 = arith.maximumf %26, %27 : vector<2x32x256xf32>
    %cst_9 = arith.constant dense<0.000000e+00> : vector<2x32xf32>
    %29 = vector.multi_reduction <add>, %28, %cst_9 [2] : vector<2x32x256xf32> to vector<2x32xf32>
    %cst_10 = arith.constant dense<0.000000e+00> : vector<2x32xf32>
    %30 = tpu.matmul %29, %2, %cst_10 {dimension_numbers = #tpu.dot_dimension_numbers<[1], [0], [0], [1], [0, 0, 1, 1], [], []>} : vector<2x32xf32>, vector<32x32xf32>, vector<2x32xf32> -> vector<2x32xf32>
    %cst_11 = arith.constant dense<0.000000e+00> : vector<32xf32>
    %31 = vector.multi_reduction <add>, %30, %cst_11 [0] : vector<2x32xf32> to vector<32xf32>
    %32 = vector.shape_cast %31 : vector<32xf32> to vector<1x32xf32>
    %cst_12 = arith.constant 2.000000e+00 : f32
    %33 = vector.broadcast %cst_12 : f32 to vector<1x32xf32>
    %34 = arith.divf %32, %33 : vector<1x32xf32>
    %35 = vector.broadcast %34 : vector<1x32xf32> to vector<2x32xf32>
    %36 = arith.subf %30, %35 : vector<2x32xf32>
    %37 = arith.mulf %36, %36 : vector<2x32xf32>
    %cst_13 = arith.constant dense<0.000000e+00> : vector<32xf32>
    %38 = vector.multi_reduction <add>, %37, %cst_13 [0] : vector<2x32xf32> to vector<32xf32>
    %39 = vector.shape_cast %38 : vector<32xf32> to vector<1x32xf32>
    %cst_14 = arith.constant 2.000000e+00 : f32
    %40 = vector.broadcast %cst_14 : f32 to vector<1x32xf32>
    %41 = arith.divf %39, %40 : vector<1x32xf32>
    %42 = vector.broadcast %34 : vector<1x32xf32> to vector<2x32xf32>
    %43 = arith.subf %30, %42 : vector<2x32xf32>
    %cst_15 = arith.constant 9.99999974E-6 : f32
    %44 = vector.broadcast %cst_15 : f32 to vector<1x32xf32>
    %45 = arith.addf %41, %44 : vector<1x32xf32>
    %46 = math.rsqrt %45 : vector<1x32xf32>
    %47 = vector.broadcast %46 : vector<1x32xf32> to vector<2x32xf32>
    %48 = arith.mulf %43, %47 : vector<2x32xf32>
    %49 = vector.broadcast %4 : vector<1x32xf32> to vector<2x32xf32>
    %50 = arith.mulf %48, %49 : vector<2x32xf32>
    %51 = vector.broadcast %5 : vector<1x32xf32> to vector<2x32xf32>
    %52 = arith.addf %50, %51 : vector<2x32xf32>
    %53 = arith.mulf %52, %52 : vector<2x32xf32>
    %cst_16 = arith.constant dense<0.000000e+00> : vector<2xf32>
    %54 = vector.multi_reduction <add>, %53, %cst_16 [1] : vector<2x32xf32> to vector<2xf32>
    %55 = vector.shape_cast %54 : vector<2xf32> to vector<2x1xf32>
    %cst_17 = arith.constant 1.000000e-24 : f32
    %56 = vector.broadcast %cst_17 : f32 to vector<2x1xf32>
    %57 = arith.maximumf %55, %56 : vector<2x1xf32>
    %58 = math.rsqrt %57 : vector<2x1xf32>
    %59 = vector.broadcast %58 : vector<2x1xf32> to vector<2x32xf32>
    %60 = arith.mulf %52, %59 : vector<2x32xf32>
    %cst_18 = arith.constant dense<0.000000e+00> : vector<2x8xf32>
    %61 = tpu.matmul %52, %3, %cst_18 {dimension_numbers = #tpu.dot_dimension_numbers<[1], [0], [0], [1], [0, 0, 1, 1], [], []>} : vector<2x32xf32>, vector<32x8xf32>, vector<2x8xf32> -> vector<2x8xf32>
    %62 = vector.broadcast %6 : vector<1x8xf32> to vector<2x8xf32>
    %63 = arith.addf %61, %62 : vector<2x8xf32>
    %cst_19 = arith.constant 0.000000e+00 : f32
    %64 = vector.broadcast %cst_19 : f32 to vector<2x88xf32>
    %65 = tpu.concatenate %60, %63, %64 in 1 : vector<2x32xf32>, vector<2x8xf32>, vector<2x88xf32> -> vector<2x128xf32>
    %c0_20 = arith.constant 0 : index
    %c0_21 = arith.constant 0 : index
    %66 = vector.load %arg2[%c0_20, %c0_21] : memref<2x128xf32, #tpu.memory_space<vmem>>, vector<2x128xf32>
    tpu.vector_store %arg2[%c0_20, %c0_21], %65 {strides = array<i32>} : memref<2x128xf32, #tpu.memory_space<vmem>>, vector<2x128xf32>,
    return
  }
}

</mosaic_0001>

<bundles_post_ra>
// kernel: tpu_custom_call.1
= control target key start
LH: loop header
LB: loop body
LE: loop exit
PB: predicated region body
PF: predicated region fallthrough
CT: control target
= control target key end

     0   :  { %7 = vsyncpa [#allocation3], 0  ;;  %s804_s0 = inlined_call_operand.vmem [shape: f32[2,3,256], index: 0, kind: input, shape index: {}]   ;;  %s805_s1 = inlined_call_operand.hbm [shape: f32[120,128], index: 1, kind: input, shape index: {}]   ;;  %s806_s2 = inlined_call_operand.hbm [shape: f32[2,128], index: 2, kind: output, shape index: {}]  }
   0x1   :  { %8 = vsyncpa [#allocation4], 0  ;;  %s710_s9 = smov [#allocation2]   ;;  %s662_s13 = scalar_lea.hbm %s805_s1, 1920 }
   0x2   :  { %s16_s10 = sshll.u32 %s710_s9, 4  ;;  %p663_p0 = scmp.ne.s32.totalorder %s805_s1, %s662_s13  ;;  %s17_s10 = int_to_ptr.vmem [resolvable:$true] %s16_s10 }
   0x3   :  { %p666_p1 = scmp.lt.u32.totalorder %s662_s13, %s805_s1 }
   0x5   :  { %p668_p2 = pnand %p666_p1, %p663_p0 }
   0x7   :  { %671 = shalt.err (!%p668_p2)
}
   0x8   :  { %s672_s18 = scalar_lea.vmem %s17_s10, 1920  ;;  %p677_p4 = scmp.lt.s32.totalorder %s17_s10, %s17_s10 }
   0x9   :  { %p673_p3 = scmp.ne.s32.totalorder %s17_s10, %s672_s18  ;;  %p678_p5 = scmp.lt.s32.totalorder %s672_s18, %s672_s18 }
   0xb   :  { %p679_p6 = por %p678_p5, %p677_p4 }
   0xd   :  { %p680_p7 = pnand %p679_p6, %p673_p3 }
   0xf   :  { %683 = shalt.err (!%p680_p7)
}
  0x10   :  { %s711_s19 = smov 128   ;;  %s712_s20 = smov 8  }
  0x11   :  { %22 = dma.hbm_to_vmem [thread:$0]  %s805_s1, 1920, %s17_s10, [#allocation3], %s711_s19, %s711_s19, %s712_s20  }
  0x12   :  { %706 = dma.done.wait [#allocation3], 1920  }
  0x13   :  { %707 = vsyncadd [#allocation3], 4294965376  ;;  %v713_v0 = vmov 1   ;;  %v714_v1 = vmov 0   ;;  %v28_v2 = vld [vmem:[#allocation2] sm:$0xff]  ;;  %v29_v3 = vld [vmem:[#allocation2 + $0x8] sm:$0xff]  ;;  %v45_v7 = vlaneseq }
  0x14   :  { %655 = vset.pattern.permute.xlu1 %v713_v0  ;;  %654 = vset.pattern.permute.xlu0 %v714_v1  ;;  %v30_v4 = vld [vmem:[#allocation2 + $0x10] sm:$0xff]  ;;  %v31_v5 = vld [vmem:[#allocation2 + $0x18] sm:$0xff]  ;;  %v715_v6 = vmov 2   ;;  %v26_v11 = vld [vmem:[%s804_s0] sm:$0x77]  ;;  %vm717_vm0 = vmmov 0  }
  0x15   :  { %154 = vperm.xlu1 %655, %v28_v2   ;;  %83 = vperm.xlu0 %654, %v28_v2   ;;  %v749_v8 = vshrl.u32 %v45_v7, 7  ;;  %v27_v14 = vld [vmem:[%s804_s0 + $0x8] sm:$0x77]  ;;  %vm344_vm1 = vcmask 130112   ;;  %vm351_vm2 = vcmask 195712   ;;  %vm358_vm3 = vcmask 261312  }
  0x16   :  { %vm379_vm4 = vcmask 1041409   ;;  %vm381_vm5 = vcmask 261120   ;;  %vm454_vm6 = vcmask 254976   ;;  %s719_s0 = smov 32   ;;  %s720_s26 = smov [#allocation5]   ;;  %vm576_vm7 = vcmask 326656  }
  0x17   :  { %v119_v9 = vsub.s32 1, %v749_v8  ;;  %v123_v10 = vsub.s32 5, %v749_v8  ;;  %v47_v12 = vsub.s32 0, %v749_v8  ;;  %v51_v13 = vsub.s32 4, %v749_v8  ;;  %s585_s27 = sshll.u32 %s720_s26, 4  ;;  %s586_s27 = int_to_ptr.vmem [resolvable:$true] %s585_s27 }
  0x18   :  { %v203_v15 = vsub.s32 2, %v749_v8  ;;  %v207_v18 = vsub.s32 6, %v749_v8  ;;  %s684_s28 = scalar_lea.vmem %s586_s27, 32  ;;  %p689_p9 = scmp.lt.s32.totalorder %s586_s27, %s586_s27 }
  0x19   :  { %158 = vperm.xlu1 %655, %v29_v3   ;;  %88 = vperm.xlu0 %654, %v29_v3   ;;  %v120_v16 = vrot.slane %v26_v11, %v119_v9  ;;  %v124_v17 = vrot.slane %v26_v11, %v123_v10  ;;  %v128_v19 = vrot.slane %v27_v14, %v119_v9  ;;  %p685_p8 = scmp.ne.s32.totalorder %s586_s27, %s684_s28  ;;  %p690_p10 = scmp.lt.s32.totalorder %s684_s28, %s684_s28 }
  0x1a   :  { %v132_v20 = vrot.slane %v27_v14, %v123_v10  ;;  %v48_v21 = vrot.slane %v26_v11, %v47_v12  ;;  %v52_v22 = vrot.slane %v26_v11, %v51_v13  ;;  %v56_v25 = vrot.slane %v27_v14, %v47_v12 }
  0x1b   :  { %v60_v26 = vrot.slane %v27_v14, %v51_v13  ;;  %v204_v27 = vrot.slane %v26_v11, %v203_v15  ;;  %v140_v28 = vrot.slane %v120_v16, %v119_v9  ;;  %v144_v29 = vrot.slane %v124_v17, %v119_v9  ;;  %p691_p11 = por %p690_p10, %p689_p9 }
  0x1c   :  { %v208_v30 = vrot.slane %v26_v11, %v207_v18  ;;  %v212_v31 = vrot.slane %v27_v14, %v203_v15  ;;  %v148_v32 = vrot.slane %v128_v19, %v119_v9  ;;  %v152_v33 = vrot.slane %v132_v20, %v119_v9 }
  0x1d   :  { %162 = vperm.xlu1 %655, %v30_v4   ;;  %93 = vperm.xlu0 %654, %v30_v4   ;;  %v68_v34 = vrot.slane %v48_v21, %v47_v12  ;;  %v72_v35 = vrot.slane %v52_v22, %v47_v12  ;;  %v76_v36 = vrot.slane %v56_v25, %v47_v12  ;;  %p692_p12 = pnand %p691_p11, %p685_p8 }
  0x1e   :  { %v80_v37 = vrot.slane %v60_v26, %v47_v12  ;;  %v216_v40 = vrot.slane %v27_v14, %v207_v18  ;;  %v763_v41 = vrot.slane %v204_v27, %v203_v15  ;;  %v765_v44 = vrot.slane %v208_v30, %v203_v15 }
  0x1f   :  { %v767_v45 = vrot.slane %v212_v31, %v203_v15 }
  0x20   :  { %v236_v10 = vrot.slane %v216_v40, %v203_v15 }
  0x21   :  { %166 = vperm.xlu1 %655, %v31_v5   ;;  %98 = vperm.xlu0 %654, %v31_v5  }
  0x25   :  { %657 = vset.pattern.permute.xlu1 %v715_v6  ;;  %656 = vset.pattern.permute.xlu0 %v715_v6 }
  0x26   :  { %242 = vperm.xlu1 %657, %v29_v3   ;;  %238 = vperm.xlu0 %656, %v28_v2  }
  0x2a   :  { %246 = vperm.xlu1 %657, %v30_v4   ;;  %250 = vperm.xlu0 %656, %v31_v5  }
  0x94   :  { %v155_v23 = vpop.permute.xlu1 %154  ;;  %v84_v24 = vpop.permute.xlu0 %83 }
  0x95   :  { %v169_v42 = vmul.f32 %v155_v23, %v140_v28  ;;  %v170_v43 = vmul.f32 %v155_v23, %v144_v29  ;;  %v177_v46 = vmul.f32 %v155_v23, %v148_v32  ;;  %v178_v47 = vmul.f32 %v155_v23, %v152_v33 }
  0x96   :  { %v101_v48 = vmul.f32 %v84_v24, %v68_v34  ;;  %v102_v49 = vmul.f32 %v84_v24, %v72_v35  ;;  %v109_v50 = vmul.f32 %v84_v24, %v76_v36  ;;  %v110_v51 = vmul.f32 %v84_v24, %v80_v37 }
  0x98   :  { %v159_v38 = vpop.permute.xlu1 %158  ;;  %v89_v39 = vpop.permute.xlu0 %88  ;;  %v185_v11 = vadd.f32 %v169_v42, %v101_v48  ;;  %v186_v13 = vadd.f32 %v170_v43, %v102_v49  ;;  %v193_v14 = vadd.f32 %v177_v46, %v109_v50  ;;  %v194_v16 = vadd.f32 %v178_v47, %v110_v51 }
  0x99   :  { %v171_v52 = vmul.f32 %v159_v38, %v140_v28  ;;  %v172_v53 = vmul.f32 %v159_v38, %v144_v29  ;;  %v179_v56 = vmul.f32 %v159_v38, %v148_v32  ;;  %v180_v57 = vmul.f32 %v159_v38, %v152_v33 }
  0x9a   :  { %v103_v58 = vmul.f32 %v89_v39, %v68_v34  ;;  %v104_v59 = vmul.f32 %v89_v39, %v72_v35  ;;  %v111_v60 = vmul.f32 %v89_v39, %v76_v36  ;;  %v112_v61 = vmul.f32 %v89_v39, %v80_v37 }
  0x9c   :  { %v163_v54 = vpop.permute.xlu1 %162  ;;  %v94_v55 = vpop.permute.xlu0 %93  ;;  %v187_v18 = vadd.f32 %v171_v52, %v103_v58  ;;  %v188_v19 = vadd.f32 %v172_v53, %v104_v59  ;;  %v195_v20 = vadd.f32 %v179_v56, %v111_v60  ;;  %v196_v21 = vadd.f32 %v180_v57, %v112_v61 }
  0x9d   :  { %v173_v62 = vmul.f32 %v163_v54, %v140_v28  ;;  %v174_v63 = vmul.f32 %v163_v54, %v144_v29  ;;  %v181_v0 = vmul.f32 %v163_v54, %v148_v32  ;;  %v105_v1 = vmul.f32 %v94_v55, %v68_v34 }
  0x9e   :  { %v106_v2 = vmul.f32 %v94_v55, %v72_v35  ;;  %v113_v3 = vmul.f32 %v94_v55, %v76_v36  ;;  %v182_v4 = vmul.f32 %v163_v54, %v152_v33  ;;  %v114_v5 = vmul.f32 %v94_v55, %v80_v37 }
  0x9f   :  { %v189_v22 = vadd.f32 %v173_v62, %v105_v1 }
  0xa0   :  { %v167_v6 = vpop.permute.xlu1 %166  ;;  %v99_v9 = vpop.permute.xlu0 %98  ;;  %v190_v23 = vadd.f32 %v174_v63, %v106_v2  ;;  %v197_v24 = vadd.f32 %v181_v0, %v113_v3  ;;  %v198_v30 = vadd.f32 %v182_v4, %v114_v5 }
  0xa1   :  { %v175_v12 = vmul.f32 %v167_v6, %v140_v28  ;;  %v107_v17 = vmul.f32 %v99_v9, %v68_v34  ;;  %v176_v25 = vmul.f32 %v167_v6, %v144_v29  ;;  %v183_v26 = vmul.f32 %v167_v6, %v148_v32 }
  0xa2   :  { %v184_v27 = vmul.f32 %v167_v6, %v152_v33  ;;  %v108_v31 = vmul.f32 %v99_v9, %v72_v35  ;;  %v115_v38 = vmul.f32 %v99_v9, %v76_v36  ;;  %v116_v15 = vmul.f32 %v99_v9, %v80_v37 }
  0xa3   :  { %v191_v40 = vadd.f32 %v175_v12, %v107_v17 }
  0xa4   :  { %v199_v17 = vadd.f32 %v183_v26, %v115_v38  ;;  %v32_v38 = vld [vmem:[#allocation2 + $0x20] sm:$0xff] }
  0xa5   :  { %v243_v39 = vpop.permute.xlu1 %242  ;;  %v239_v28 = vpop.permute.xlu0 %238 }
  0xa6   :  { %v255_v42 = vmul.f32 %v243_v39, %v763_v41  ;;  %v256_v34 = vmul.f32 %v243_v39, %v765_v44  ;;  %v263_v43 = vmul.f32 %v243_v39, %v767_v45  ;;  %v264_v46 = vmul.f32 %v243_v39, %v236_v10 }
  0xa7   :  { %v253_v47 = vmul.f32 %v239_v28, %v763_v41  ;;  %v254_v29 = vmul.f32 %v239_v28, %v765_v44  ;;  %v261_v32 = vmul.f32 %v239_v28, %v767_v45  ;;  %v262_v33 = vmul.f32 %v239_v28, %v236_v10 }
  0xa8   :  { %v271_v35 = vadd.f32 %v255_v42, %v187_v18  ;;  %v272_v36 = vadd.f32 %v256_v34, %v188_v19  ;;  %v279_v37 = vadd.f32 %v263_v43, %v195_v20  ;;  %v280_v48 = vadd.f32 %v264_v46, %v196_v21  ;;  %v34_v46 = vld [vmem:[#allocation2 + $0x30] sm:$0xff] }
  0xa9   :  { %v247_v49 = vpop.permute.xlu1 %246  ;;  %v251_v50 = vpop.permute.xlu0 %250  ;;  %v269_v51 = vadd.f32 %v253_v47, %v185_v11  ;;  %v270_v52 = vadd.f32 %v254_v29, %v186_v13  ;;  %v277_v53 = vadd.f32 %v261_v32, %v193_v14  ;;  %v278_v54 = vadd.f32 %v262_v33, %v194_v16  ;;  %v35_v47 = vld [vmem:[#allocation2 + $0x38] sm:$0xff] }
  0xaa   :  { %v257_v55 = vmul.f32 %v247_v49, %v763_v41  ;;  %v258_v56 = vmul.f32 %v247_v49, %v765_v44  ;;  %v265_v57 = vmul.f32 %v247_v49, %v767_v45  ;;  %v266_v58 = vmul.f32 %v247_v49, %v236_v10 }
  0xab   :  { %v259_v59 = vmul.f32 %v251_v50, %v763_v41  ;;  %v260_v60 = vmul.f32 %v251_v50, %v765_v44  ;;  %v267_v61 = vmul.f32 %v251_v50, %v767_v45  ;;  %v268_v62 = vmul.f32 %v251_v50, %v236_v10 }
  0xac   :  { %v287_v63 = vmax.f32 %v271_v35, 0.0  ;;  %v288_v0 = vmax.f32 %v272_v36, 0.0  ;;  %v285_v1 = vmax.f32 %v269_v51, 0.0  ;;  %v286_v2 = vmax.f32 %v270_v52, 0.0 }
  0xad   :  { %v293_v3 = vmax.f32 %v277_v53, 0.0  ;;  %v294_v4 = vmax.f32 %v278_v54, 0.0  ;;  %v295_v5 = vmax.f32 %v279_v37, 0.0  ;;  %v296_v6 = vmax.f32 %v280_v48, 0.0 }
  0xae   :  { %v304_v9 = vadd.f32 %v288_v0, %v287_v63  ;;  %v301_v11 = vadd.f32 %v286_v2, %v285_v1  ;;  %v273_v12 = vadd.f32 %v257_v55, %v189_v22  ;;  %v274_v13 = vadd.f32 %v258_v56, %v190_v23 }
  0xaf   :  { %v281_v14 = vadd.f32 %v265_v57, %v197_v24  ;;  %v282_v16 = vadd.f32 %v266_v58, %v198_v30  ;;  %v192_v41 = vadd.f32 %v176_v25, %v108_v31  ;;  %v313_v44 = vadd.f32 %v294_v4, %v293_v3 }
  0xb0   :  { %305 = vadd.xlane.f32.xlu0 %v304_v9  ;;  %302 = vadd.xlane.f32.xlu1 %v301_v11  ;;  %v316_v45 = vadd.f32 %v296_v6, %v295_v5  ;;  %v200_v10 = vadd.f32 %v184_v27, %v116_v15  ;;  %v289_v18 = vmax.f32 %v273_v12, 0.0  ;;  %v290_v19 = vmax.f32 %v274_v13, 0.0  ;;  %v33_v15 = vld [vmem:[#allocation2 + $0x28] sm:$0xff]  ;;  %v36_v12 = vld [vmem:[#allocation2 + $0x40] sm:$0xff] }
  0xb1   :  { %v275_v20 = vadd.f32 %v259_v59, %v191_v40  ;;  %v276_v21 = vadd.f32 %v260_v60, %v192_v41  ;;  %v297_v39 = vmax.f32 %v281_v14, 0.0  ;;  %v298_v28 = vmax.f32 %v282_v16, 0.0  ;;  %v37_v13 = vld [vmem:[#allocation2 + $0x48] sm:$0xff]  ;;  %v38_v16 = vld [vmem:[#allocation2 + $0x50] sm:$0xff]  ;;  %v39_v41 = vld [vmem:[#allocation2 + $0x58] sm:$0xff] }
  0xb2   :  { %v283_v42 = vadd.f32 %v267_v61, %v199_v17  ;;  %v284_v34 = vadd.f32 %v268_v62, %v200_v10  ;;  %v307_v22 = vadd.f32 %v290_v19, %v289_v18  ;;  %v632_v40 = vpack.c.bf16 %v33_v15, %v32_v38 }
  0xb3   :  { %v291_v23 = vmax.f32 %v275_v20, 0.0  ;;  %v319_v24 = vadd.f32 %v298_v28, %v297_v39  ;;  %v292_v25 = vmax.f32 %v276_v21, 0.0  ;;  %v716_v43 = vmov 0.0|0.0  }
  0xb4   :  { %314 = vadd.xlane.f32.xlu0 %v313_v44  ;;  %317 = vadd.xlane.f32.xlu1 %v316_v45  ;;  %v299_v26 = vmax.f32 %v283_v42, 0.0  ;;  %v300_v30 = vmax.f32 %v284_v34, 0.0  ;;  %v635_v29 = vpack.c.bf16 %v35_v47, %v34_v46  ;;  %v718_v32 = vmov 0.0   ;;  %v596_v47 = vld [vmem:[#allocation2 + $0x68] ss:$0 sm:$0xff] }
  0xb5   :  { %v310_v31 = vadd.f32 %v292_v25, %v291_v23  ;;  %631 = vmatprep.subr.bf16.mxu0 %v716_v43  ;;  %637 = vmatprep.subr.bf16.mxu1 %v716_v43  ;;  %v334_v33 = vand.u32 127, %v45_v7  ;;  %v638_v14 = vpack.c.bf16 %v37_v13, %v36_v12  ;;  %v641_v17 = vpack.c.bf16 %v39_v41, %v38_v16 }
  0xb6   :  { %v322_v27 = vadd.f32 %v300_v30, %v299_v26  ;;  %633 = vmatpush3.bf16.msra.mxu0 %v632_v40  ;;  %617 = vmatprep.mubr.msk.f32.mxu0 %vm717_vm0, %v718_v32 }
  0xb7   :  { %634 = vmatprep.subr.bf16.mxu0 %v716_v43  ;;  %628 = vmatprep.mubr.msk.f32.mxu1 %vm717_vm0, %v718_v32  ;;  %v339_v37 = vadd.s32 4294967288, %v334_v33  ;;  %v346_v48 = vadd.s32 4294967280, %v334_v33  ;;  %v353_v51 = vadd.s32 4294967272, %v334_v33  ;;  %v337_v53 = vsub.s32 %v334_v33, %v749_v8 }
  0xb8   :  { %308 = vadd.xlane.f32.xlu0 %v307_v22  ;;  %320 = vadd.xlane.f32.xlu1 %v319_v24 }
  0xb9   :  { %v342_v52 = vsub.s32 %v339_v37, %v749_v8  ;;  %v349_v54 = vsub.s32 %v346_v48, %v749_v8  ;;  %v356_v57 = vsub.s32 %v353_v51, %v749_v8  ;;  %639 = vmatpush3.bf16.msra.mxu1 %v638_v14 }
  0xba   :  { %636 = vmatpush3.bf16.msra.mxu0 %v635_v29  ;;  %640 = vmatprep.subr.bf16.mxu1 %v716_v43  ;;  %v595_v43 = vld [vmem:[#allocation2 + $0x60] ss:$0 sm:$0xff] }
  0xbc   :  { %311 = vadd.xlane.f32.xlu0 %v310_v31  ;;  %323 = vadd.xlane.f32.xlu1 %v322_v27 }
  0xbd   :  { %642 = vmatpush3.bf16.msra.mxu1 %v641_v17 }
 0x13d   :  { %v306_v35 = vpop.xlane.xlu0 %305  ;;  %v303_v36 = vpop.xlane.xlu1 %302 }
 0x13e   :  { %v343_v58 = vrot.slane %v306_v35, %v342_v52  ;;  %v338_v59 = vrot.slane %v303_v36, %v337_v53  ;;  %v597_v36 = vld [vmem:[#allocation2 + $0x70] ss:$0 sm:$0xff] }
 0x140   :  { %v345_v1 = vsel %vm344_vm1, %v343_v58, %v338_v59 }
 0x141   :  { %v315_v49 = vpop.xlane.xlu0 %314  ;;  %v318_v50 = vpop.xlane.xlu1 %317 }
 0x142   :  { %v363_v7 = vrot.slane %v315_v49, %v337_v53  ;;  %v367_v60 = vrot.slane %v318_v50, %v342_v52 }
 0x144   :  { %v368_v2 = vsel %vm344_vm1, %v367_v60, %v363_v7 }
 0x145   :  { %v309_v55 = vpop.xlane.xlu0 %308  ;;  %v321_v56 = vpop.xlane.xlu1 %320 }
 0x146   :  { %v350_v61 = vrot.slane %v309_v55, %v349_v54  ;;  %v372_v62 = vrot.slane %v321_v56, %v349_v54 }
 0x148   :  { %v352_v5 = vsel %vm351_vm2, %v350_v61, %v345_v1  ;;  %v373_v6 = vsel %vm351_vm2, %v372_v62, %v368_v2 }
 0x149   :  { %v312_v63 = vpop.xlane.xlu0 %311  ;;  %v324_v0 = vpop.xlane.xlu1 %323 }
 0x14a   :  { %v357_v3 = vrot.slane %v312_v63, %v356_v57  ;;  %v377_v4 = vrot.slane %v324_v0, %v356_v57 }
 0x14c   :  { %v359_v8 = vsel %vm358_vm3, %v357_v3, %v352_v5  ;;  %v378_v9 = vsel %vm358_vm3, %v377_v4, %v373_v6 }
 0x14d   :  { %v380_v11 = vsel %vm379_vm4, %v378_v9, %v359_v8 }
 0x14e   :  { %618 = vmatmul.mubr.msk.f32.vlgmr.msra.gmra.mrb[0].mxu0 %vm381_vm5, %v380_v11 }
 0x221   :  { %v450_v44 = vpop.f32.mrb[0].mxu0 }
 0x222   :  { %v455_v45 = vsel %vm454_vm6, %v450_v44, 0.0  ;;  %v619_v10 = vpop.f32.mrb[1].mxu0 }
 0x223   :  { %v456_v18 = vrot.slane %v455_v45, 4 }
 0x225   :  { %v457_v19 = vadd.f32 %v456_v18, %v455_v45 }
 0x227   :  { %v458_v20 = vrot.slane %v457_v19, 2 }
 0x229   :  { %v459_v21 = vadd.f32 %v458_v20, %v457_v19 }
 0x22b   :  { %v460_v39 = vrot.slane %v459_v21, 1 }
 0x22d   :  { %v461_v28 = vadd.f32 %v460_v39, %v459_v21 }
 0x22f   :  { %v463_v42 = vmul.f32 0.5, %v461_v28 }
 0x231   :  { %v464_v34 = vsub.f32 %v450_v44, %v463_v42 }
 0x233   :  { %v465_v22 = vmul.f32 %v464_v34, %v464_v34 }
 0x235   :  { %v466_v23 = vsel %vm454_vm6, %v465_v22, 0.0 }
 0x236   :  { %v467_v24 = vrot.slane %v466_v23, 4 }
 0x238   :  { %v468_v25 = vadd.f32 %v467_v24, %v466_v23 }
 0x23a   :  { %v469_v26 = vrot.slane %v468_v25, 2 }
 0x23c   :  { %v470_v30 = vadd.f32 %v469_v26, %v468_v25 }
 0x23e   :  { %v471_v31 = vrot.slane %v470_v30, 1 }
 0x240   :  { %v472_v27 = vadd.f32 %v471_v31, %v470_v30 }
 0x242   :  { %v473_v38 = vmul.f32 0.5, %v472_v27 }
 0x244   :  { %v474_v15 = vadd.f32 1e-05, %v473_v38 }
 0x246   :  { %658 = vrsqrt.f32 %v474_v15 }
 0x250   :  { %v659_v40 = vpop.eup %658 }
 0x251   :  { %v476_v46 = vmul.f32 %v659_v40, %v464_v34 }
 0x253   :  { %v481_v29 = vmul.f32 %v595_v43, %v476_v46 }
 0x255   :  { %v486_v32 = vadd.f32 %v596_v47, %v481_v29 }
 0x257   :  { %629 = vmatmul.mubr.msk.f32.vlgmr.msra.gmra.mrb[0].mxu1 %vm381_vm5, %v486_v32  ;;  %v487_v33 = vmul.f32 %v486_v32, %v486_v32 }
 0x259   :  { %v488_v35 = vsel %vm454_vm6, %v487_v33, 0.0 }
 0x25a   :  { %489 = vadd.xlane.f32.xlu0 %v488_v35 }
 0x2e7   :  { %v490_v50 = vpop.xlane.xlu0 %489 }
 0x2e8   :  { %v491_v51 = vmax.f32 %v490_v50, 1e-24 }
 0x2ea   :  { %660 = vrsqrt.f32 %v491_v51 }
 0x2f4   :  { %v661_v52 = vpop.eup %660 }
 0x2f5   :  { %v493_v53 = vmul.f32 %v661_v52, %v486_v32 }
 0x32a   :  { %v567_v37 = vpop.f32.mrb[0].mxu1 }
 0x32b   :  { %v568_v48 = vadd.f32 %v597_v36, %v567_v37  ;;  %v630_v49 = vpop.f32.mrb[1].mxu1 }
 0x32d   :  { %572 = vrot.lane.b32.xlu1 %v568_v48, %s719_s0 }
 0x39f   :  { %v573_v54 = vpop.permute.xlu1 %572 }
 0x3a0   :  { %v575_v55 = vsel %vm381_vm5, %v493_v53, %v573_v54 }
 0x3a1   :  { %v577_v56 = vsel %vm576_vm7, %v575_v55, 0.0 }
 0x3a2   :  { %578 = vst [vmem:[#allocation5] sm:$0x3] %v577_v56 }
 0x3a3   :  { %695 = shalt.err (!%p692_p12)
}
 0x3a4   :  { %s696_s3 = scalar_lea.hbm %s806_s2, 32 }
 0x3a5   :  { %p697_p13 = scmp.ne.s32.totalorder %s806_s2, %s696_s3  ;;  %p700_p0 = scmp.lt.u32.totalorder %s696_s3, %s806_s2 }
 0x3a7   :  { %p702_p1 = pnand %p700_p0, %p697_p13 }
 0x3a9   :  { %705 = shalt.err (!%p702_p1)
}
 0x3aa   :  { %588 = dma.vmem_to_hbm [thread:$0]  %s586_s27, 32, %s806_s2, [#allocation4]  }
 0x3ab   :  { %708 = dma.done.wait [#allocation4], 32  }
 0x3ac   :  { %709 = vsyncadd [#allocation4], 4294967264 }
 0x3ad   :  { %592 = vsyncpa [#allocation3], 1 }
 0x3ae   :  { %593 = vsyncpa [#allocation4], 1 }

</bundles_post_ra>
